<compile_context>
chip_gen: v5e
topology: v5e:2x2
jax: 0.10.0
libtpu: 0.0.40
codegen_flags: <defaults>
</compile_context>

<pallas_src>
import functools
import math

import jax
import jax.numpy as jnp
from jax import lax
from jax.experimental import pallas as pl
from jax.experimental.pallas import tpu as pltpu

_SQRT1_2 = 0.7071067811865476        # 1/sqrt(2) for exact (erf) GELU
_SQRT2_OVER_PI = 0.7978845608028654  # sqrt(2/pi) for tanh GELU
_LN_EPS = 1e-5                       # torch nn.LayerNorm default eps
_MAX_REL = 96                        # MultiHeadRelativeAttention.max_relative_position


# ---------------------------------------------------------------------------
# Tiling / VMEM helpers
# ---------------------------------------------------------------------------

def _round_up(x, m):
    return (x + m - 1) // m * m


def _tpu_vmem_bytes():
    try:
        return int(pltpu.get_tpu_info().vmem_capacity_bytes)
    except Exception:
        return 64 << 20          # conservative fallback: v7x per-TC VMEM


def _row_tile_cap():
    # v7x has half the per-TensorCore VMEM of v5e/v6e -> smaller row-tile cap.
    return 512 if _tpu_vmem_bytes() >= (96 << 20) else 256


def _choose_row_tile(m, cap):
    """Sublane-aligned (x8) row tile; targets >= 2 grid steps so both v7x
    TensorCores get work under dimension_semantics=('parallel',)."""
    return min(cap, max(8, _round_up(-(-m // 2), 8)))


def _vmem_limit_bytes(footprint):
    phys = _tpu_vmem_bytes()
    want = footprint + (8 << 20)             # headroom for compiler scratch
    return int(min(max(want, 32 << 20), int(phys * 0.9)))


def _rowwise_call(kernel, row_args, const_args, out_cols, tm, *, cost_estimate=None):
    """Run a row-tiled kernel over 2D (M, d_i) inputs. M must be tm-aligned
    (padding is done once in the top-level forward, not here)."""
    m = row_args[0].shape[0]
    assert m % tm == 0, (m, tm)
    out_dtype = row_args[0].dtype

    row_specs = [pl.BlockSpec((tm, a.shape[1]), lambda i: (i, 0)) for a in row_args]
    # Constants (weights / biases / LN affine): constant (0, 0) index_map keeps
    # them VMEM-resident across grid steps (no per-step re-DMA).
    const_specs = [pl.BlockSpec(a.shape, lambda i: (0, 0)) for a in const_args]

    row_bytes = sum(tm * a.shape[1] * a.dtype.itemsize for a in row_args)
    row_bytes += tm * out_cols * jnp.dtype(out_dtype).itemsize
    const_bytes = sum(a.size * a.dtype.itemsize for a in const_args)
    vmem_limit = _vmem_limit_bytes(2 * row_bytes + 2 * const_bytes)

    return pl.pallas_call(
        kernel,
        out_shape=jax.ShapeDtypeStruct((m, out_cols), out_dtype),
        grid_spec=pltpu.PrefetchScalarGridSpec(
            num_scalar_prefetch=0,
            grid=(m // tm,),
            in_specs=row_specs + const_specs,
            out_specs=pl.BlockSpec((tm, out_cols), lambda i: (i, 0)),
        ),
        compiler_params=pltpu.CompilerParams(
            dimension_semantics=("parallel",),
            vmem_limit_bytes=vmem_limit),
        cost_estimate=cost_estimate,
    )(*row_args, *const_args)


# ---------------------------------------------------------------------------
# In-kernel math
# ---------------------------------------------------------------------------

def _layernorm(x, gamma, beta):
    mu = jnp.mean(x, axis=-1, keepdims=True)
    var = jnp.mean(jnp.square(x - mu), axis=-1, keepdims=True)
    return (x - mu) * lax.rsqrt(var + _LN_EPS) * gamma + beta


def _gelu_erf(h):
    # Exact GELU (torch nn.GELU() default) -> torch-parity path.
    return 0.5 * h * (1.0 + lax.erf(h * jnp.float32(_SQRT1_2)))


def _gelu_tanh(h):
    # tanh approximation: EUP slot instead of a VALU erf polynomial.
    return 0.5 * h * (1.0 + jnp.tanh(jnp.float32(_SQRT2_OVER_PI)
                                     * (h + jnp.float32(0.044715) * h * h * h)))


# ---------------------------------------------------------------------------
# Kernels
# ---------------------------------------------------------------------------

def _ln_qkv_kernel(x_ref, g_ref, b_ref, w_ref, bias_ref, o_ref):
    x = x_ref[...]
    h = _layernorm(x, g_ref[...], b_ref[...])
    # Cast activations to the weight dtype (bf16 on the fast path) so the MXU
    # runs its native bf16 pipeline; accumulate in f32.
    y = jnp.dot(h.astype(w_ref.dtype), w_ref[...],
                preferred_element_type=jnp.float32)
    o_ref[...] = (y + bias_ref[...]).astype(o_ref.dtype)


def _attn_mlp_res_kernel(approx_gelu, hidden_chunk,
                         a_ref, x_ref, wop_ref, bop_ref, g2_ref, b2_ref,
                         wfc_ref, bfc_ref, wpr_ref, bpr_ref, o_ref):
    """Folded attention output projection + residual + LN2 + MLP + residual."""
    a = a_ref[...]
    x = x_ref[...]
    # x1 = x + a @ (w_o @ w_ap) + (b_o @ w_ap + b_ap)
    x1 = x + jnp.dot(a.astype(wop_ref.dtype), wop_ref[...],
                     preferred_element_type=jnp.float32) + bop_ref[...]
    xn = _layernorm(x1, g2_ref[...], b2_ref[...])
    xn_mm = xn.astype(wfc_ref.dtype)

    gelu = _gelu_tanh if approx_gelu else _gelu_erf
    hidden = wfc_ref.shape[1]
    acc = jnp.zeros(x1.shape, jnp.float32)
    # K-chunk the hidden dim (static slices -> zero-cost ref views): bounds the
    # live (tm, chunk) activation without a VMEM scratch round-trip.
    for c0 in range(0, hidden, hidden_chunk):
        c1 = min(c0 + hidden_chunk, hidden)
        h = jnp.dot(xn_mm, wfc_ref[:, c0:c1], preferred_element_type=jnp.float32)
        h = gelu(h + bfc_ref[:, c0:c1])
        acc = acc + jnp.dot(h.astype(wpr_ref.dtype), wpr_ref[c0:c1, :],
                            preferred_element_type=jnp.float32)
    o_ref[...] = (x1 + acc + bpr_ref[...]).astype(o_ref.dtype)


# ---------------------------------------------------------------------------
# Per-sub-block wrappers (BlockSpecs / cost estimates)
# ---------------------------------------------------------------------------

def _ln_qkv(x2d, p, tm):
    m, w = x2d.shape
    w3 = p["w_qkv"].shape[1]
    wbytes = p["w_qkv"].size * p["w_qkv"].dtype.itemsize
    cost = pl.CostEstimate(
        flops=int(2 * m * w * w3 + 8 * m * w),
        transcendentals=int(m),
        bytes_accessed=int(4 * m * (w + w3) + wbytes + 4 * (w3 + 2 * w)))
    return _rowwise_call(
        _ln_qkv_kernel,
        [x2d],
        [p["ln1_g"], p["ln1_b"], p["w_qkv"], p["b_qkv"]],
        w3, tm, cost_estimate=cost)


def _attn_mlp_res(a2d, x2d, p, tm, fast_math):
    m, w = a2d.shape
    hidden = p["w_fc"].shape[1]
    hidden_chunk = min(hidden, 512)
    kernel = functools.partial(_attn_mlp_res_kernel, bool(fast_math), hidden_chunk)
    wbytes = sum(p[k].size * p[k].dtype.itemsize for k in ("w_op", "w_fc", "w_pr"))
    cost = pl.CostEstimate(
        flops=int(2 * m * w * w + 4 * m * w * hidden + 16 * m * w + 8 * m * hidden),
        transcendentals=int(m * hidden + m),
        bytes_accessed=int(4 * 3 * m * w + wbytes + 4 * (hidden + 4 * w)))
    return _rowwise_call(
        kernel,
        [a2d, x2d],
        [p["w_op"], p["b_op"], p["ln2_g"], p["ln2_b"],
         p["w_fc"], p["b_fc"], p["w_pr"], p["b_pr"]],
        w, tm, cost_estimate=cost)


# ---------------------------------------------------------------------------
# Parameter preparation (fold fc_o @ c_proj; optional bf16 weights)
# ---------------------------------------------------------------------------

def _prepare_block_params(p, use_bf16):
    # No nonlinearity between fc_o and c_proj -> exact fold (up to roundoff):
    #   c_proj(fc_o(a)) = a @ (w_o @ w_ap) + (b_o @ w_ap + b_ap)
    w_op = jnp.dot(p["w_o"], p["w_ap"], preferred_element_type=jnp.float32)
    b_op = jnp.dot(p["b_o"], p["w_ap"], preferred_element_type=jnp.float32) + p["b_ap"]
    mm_dtype = jnp.bfloat16 if use_bf16 else jnp.float32
    q = dict(p)
    q.update(
        w_qkv=p["w_qkv"].astype(mm_dtype),
        w_op=w_op.astype(mm_dtype),
        b_op=b_op,                       # biases / LN affine stay f32
        w_fc=p["w_fc"].astype(mm_dtype),
        w_pr=p["w_pr"].astype(mm_dtype),
    )
    return q


# ---------------------------------------------------------------------------
# Relative-position attention core (plain JAX)
# ---------------------------------------------------------------------------

def _relative_table_lookup(table, length):
    # Mirrors RelativePosition.forward (requires even length, as the module does).
    half = length // 2
    rng = jnp.concatenate([jnp.arange(half + 1), jnp.arange(half - 1, 0, -1)])
    dist = rng[None, :] - rng[:, None]                 # k - q
    idx = jnp.clip(dist, -_MAX_REL, _MAX_REL) + _MAX_REL
    return table[idx]                                  # (Lq, Lk, head_dim)


def _relative_attention_core(qkv, rk2, rv2, n_heads):
    # TODO(synk): port this softmax + relative-bias core to a flash-style
    # Pallas kernel (fold q@rk2 into the score tile, rel-V into PV accumulation)
    # for production sequence lengths; kept in plain JAX here.
    b, s, w3 = qkv.shape
    w = w3 // 3
    dh = w // n_heads
    q, k, v = jnp.split(qkv, 3, axis=2)
    qh = q.reshape(b, s, n_heads, dh).transpose(0, 2, 1, 3)
    kh = k.reshape(b, s, n_heads, dh).transpose(0, 2, 1, 3)
    vh = v.reshape(b, s, n_heads, dh).transpose(0, 2, 1, 3)
    attn = jnp.einsum("bhqd,bhkd->bhqk", qh, kh)
    attn = attn + jnp.einsum("bhqd,qkd->bhqk", qh, rk2)
    # Relative-K bias added BEFORE the 1/sqrt(d_h) scaling, matching torch:
    # attn = (attn1 + attn2) / self.scale
    attn = jax.nn.softmax(attn / jnp.sqrt(jnp.float32(dh)), axis=-1)
    # dropout(p=0) and mask=None in this module's path -> identity / skipped.
    out = jnp.einsum("bhqk,bhkd->bhqd", attn, vh)
    out = out + jnp.einsum("bhqk,qkd->bhqd", attn, rv2)
    return out.transpose(0, 2, 1, 3).reshape(b, s, w)


# ---------------------------------------------------------------------------
# Full ContourTransformer forward
# ---------------------------------------------------------------------------

@functools.partial(jax.jit, static_argnames=("n_heads", "fast_math"))
def contour_transformer_pallas(x, params, *, n_heads, fast_math=True):
    b, s, w = x.shape
    m = b * s
    tm = _choose_row_tile(m, _row_tile_cap())
    # Pad whole sequences ONCE so M_pad % tm == 0; padded (zero) sequences flow
    # through every layer (attention included) and are sliced off at the end,
    # avoiding per-layer pad/slice HBM copies. Padded rows stay finite & O(1)
    # (LN of zeros -> beta), so the bf16 casts are safe.
    b_pad = _round_up(b, tm // math.gcd(tm, s))
    if b_pad != b:
        x = jnp.pad(x, ((0, b_pad - b), (0, 0), (0, 0)))
    m_pad = b_pad * s
    x2d = x.reshape(m_pad, w).astype(jnp.float32)

    prepared = [_prepare_block_params(p, fast_math) for p in params]
    for p in prepared:
        rk2 = _relative_table_lookup(p["rel_k"], s)
        rv2 = _relative_table_lookup(p["rel_v"], s)
        qkv = _ln_qkv(x2d, p, tm).reshape(b_pad, s, 3 * w)
        a = _relative_attention_core(qkv, rk2, rv2, n_heads)
        x2d = _attn_mlp_res(a.reshape(m_pad, w), x2d, p, tm, fast_math)
    out = jnp.mean(x2d.reshape(b_pad, s, w), axis=1)
    return out[:b]


# ---------------------------------------------------------------------------
# Pure-JAX reference (torch-faithful), parameter init, self-test
# ---------------------------------------------------------------------------

def _layernorm_ref(x, g, b):
    mu = x.mean(-1, keepdims=True)
    var = ((x - mu) ** 2).mean(-1, keepdims=True)
    return (x - mu) / jnp.sqrt(var + _LN_EPS) * g + b


def contour_transformer_reference(x, params, *, n_heads):
    b, s, w = x.shape
    for p in params:
        rk2 = _relative_table_lookup(p["rel_k"], s)
        rv2 = _relative_table_lookup(p["rel_v"], s)
        h = _layernorm_ref(x, p["ln1_g"], p["ln1_b"])
        qkv = h @ p["w_qkv"] + p["b_qkv"]
        a = _relative_attention_core(qkv, rk2, rv2, n_heads)
        a = a @ p["w_o"] + p["b_o"]
        a = a @ p["w_ap"] + p["b_ap"]
        x = x + a
        h = _layernorm_ref(x, p["ln2_g"], p["ln2_b"])
        h = jax.nn.gelu(h @ p["w_fc"] + p["b_fc"], approximate=False)
        x = x + (h @ p["w_pr"] + p["b_pr"])
    return jnp.mean(x, axis=1)


def _init_linear(key, fan_in, fan_out):
    kw, kb = jax.random.split(key)
    bound = 1.0 / math.sqrt(fan_in)
    # Stored as (in, out) so kernels compute x @ W directly.
    w = jax.random.uniform(kw, (fan_in, fan_out), jnp.float32, -bound, bound)
    b = jax.random.uniform(kb, (1, fan_out), jnp.float32, -bound, bound)
    return w, b


def _init_block(key, width, heads):
    head_dim = width // heads
    ks = jax.random.split(key, 8)
    w_qkv, b_qkv = _init_linear(ks[0], width, 3 * width)
    w_o, b_o = _init_linear(ks[1], width, width)       # attention fc_o
    w_ap, b_ap = _init_linear(ks[2], width, width)     # wrapper c_proj
    w_fc, b_fc = _init_linear(ks[3], width, 4 * width)
    w_pr, b_pr = _init_linear(ks[4], 4 * width, width)
    xav = math.sqrt(6.0 / (2 * _MAX_REL + 1 + head_dim))
    rel_k = jax.random.uniform(ks[5], (2 * _MAX_REL + 1, head_dim),
                               jnp.float32, -xav, xav)
    rel_v = jax.random.uniform(ks[6], (2 * _MAX_REL + 1, head_dim),
                               jnp.float32, -xav, xav)
    kg = jax.random.split(ks[7], 4)
    ln1_g = 1.0 + 0.05 * jax.random.normal(kg[0], (1, width), jnp.float32)
    ln1_b = 0.05 * jax.random.normal(kg[1], (1, width), jnp.float32)
    ln2_g = 1.0 + 0.05 * jax.random.normal(kg[2], (1, width), jnp.float32)
    ln2_b = 0.05 * jax.random.normal(kg[3], (1, width), jnp.float32)
    return dict(w_qkv=w_qkv, b_qkv=b_qkv, w_o=w_o, b_o=b_o, w_ap=w_ap,
                b_ap=b_ap, w_fc=w_fc, b_fc=b_fc, w_pr=w_pr, b_pr=b_pr,
                rel_k=rel_k, rel_v=rel_v,
                ln1_g=ln1_g, ln1_b=ln1_b, ln2_g=ln2_g, ln2_b=ln2_b)


if __name__ == "__main__":
    width, heads, layers = 32, 2, 2
    batch, seq = 2, 16          # seq must be even (RelativePosition contract)

    key = jax.random.PRNGKey(0)
    kx, kp = jax.random.split(key)
    x = jax.random.normal(kx, (batch, seq, width), jnp.float32)
    params = [_init_block(k, width, heads) for k in jax.random.split(kp, layers)]

    y_ref = contour_transformer_reference(x, params, n_heads=heads)

    # Torch-parity path: f32 matmul operands + exact (erf) GELU. Tolerance is
    # slightly above 1e-4 only because of the exact fc_o@c_proj fold roundoff.
    y_acc = jax.block_until_ready(
        contour_transformer_pallas(x, params, n_heads=heads, fast_math=False))
    assert y_acc.shape == (batch, width)
    err_acc = float(jnp.max(jnp.abs(y_acc - y_ref)))
    assert jnp.allclose(y_acc, y_ref, atol=2e-4, rtol=2e-4), err_acc

    # Fast path: bf16 MXU operands + tanh GELU (EUP); looser tolerance.
    y_fast = jax.block_until_ready(
        contour_transformer_pallas(x, params, n_heads=heads, fast_math=True))
    assert y_fast.shape == (batch, width)
    err_fast = float(jnp.max(jnp.abs(y_fast - y_ref)))
    assert jnp.allclose(y_fast, y_ref, atol=5e-2, rtol=5e-2), err_fast

    print("KERNEL_OK")
</pallas_src>

<mosaic_0001>
module attributes {stable_mosaic.version = 11 : i64} {
  func.func @_ln_qkv_kernel(%arg0: i32, %arg1: memref<16x32xf32, #tpu.memory_space<vmem>>, %arg2: memref<1x32xf32, #tpu.memory_space<vmem>>, %arg3: memref<1x32xf32, #tpu.memory_space<vmem>>, %arg4: memref<32x96xf32, #tpu.memory_space<vmem>>, %arg5: memref<1x96xf32, #tpu.memory_space<vmem>>, %arg6: memref<16x96xf32, #tpu.memory_space<vmem>>) attributes {dimension_semantics = [#tpu.dimension_semantics<parallel>], iteration_bounds = array<i64: 2>, scalar_prefetch = 0 : i64, scratch_operands = 0 : i64, tpu.core_type = #tpu.core_type<tc>, window_params = [{transform_indices = @transform_0, window_bounds = array<i64: 16, 32>}, {pipeline_mode = #tpu.pipeline_mode<synchronous>, transform_indices = @transform_1, window_bounds = array<i64: 1, 32>}, {pipeline_mode = #tpu.pipeline_mode<synchronous>, transform_indices = @transform_2, window_bounds = array<i64: 1, 32>}, {pipeline_mode = #tpu.pipeline_mode<synchronous>, transform_indices = @transform_3, window_bounds = array<i64: 32, 96>}, {pipeline_mode = #tpu.pipeline_mode<synchronous>, transform_indices = @transform_4, window_bounds = array<i64: 1, 96>}, {transform_indices = @transform_5, window_bounds = array<i64: 16, 96>}]} {
    %c0 = arith.constant 0 : index
    %c0_0 = arith.constant 0 : index
    %0 = vector.load %arg1[%c0, %c0_0] : memref<16x32xf32, #tpu.memory_space<vmem>>, vector<16x32xf32>
    %c0_1 = arith.constant 0 : index
    %c0_2 = arith.constant 0 : index
    %1 = vector.load %arg2[%c0_1, %c0_2] : memref<1x32xf32, #tpu.memory_space<vmem>>, vector<1x32xf32>
    %c0_3 = arith.constant 0 : index
    %c0_4 = arith.constant 0 : index
    %2 = vector.load %arg3[%c0_3, %c0_4] : memref<1x32xf32, #tpu.memory_space<vmem>>, vector<1x32xf32>
    %cst = arith.constant dense<0.000000e+00> : vector<16xf32>
    %3 = vector.multi_reduction <add>, %0, %cst [1] : vector<16x32xf32> to vector<16xf32>
    %4 = vector.shape_cast %3 : vector<16xf32> to vector<16x1xf32>
    %cst_5 = arith.constant 3.200000e+01 : f32
    %5 = vector.broadcast %cst_5 : f32 to vector<16x1xf32>
    %6 = arith.divf %4, %5 : vector<16x1xf32>
    %7 = vector.broadcast %6 : vector<16x1xf32> to vector<16x32xf32>
    %8 = arith.subf %0, %7 : vector<16x32xf32>
    %9 = arith.mulf %8, %8 : vector<16x32xf32>
    %cst_6 = arith.constant dense<0.000000e+00> : vector<16xf32>
    %10 = vector.multi_reduction <add>, %9, %cst_6 [1] : vector<16x32xf32> to vector<16xf32>
    %11 = vector.shape_cast %10 : vector<16xf32> to vector<16x1xf32>
    %cst_7 = arith.constant 3.200000e+01 : f32
    %12 = vector.broadcast %cst_7 : f32 to vector<16x1xf32>
    %13 = arith.divf %11, %12 : vector<16x1xf32>
    %14 = vector.broadcast %6 : vector<16x1xf32> to vector<16x32xf32>
    %15 = arith.subf %0, %14 : vector<16x32xf32>
    %cst_8 = arith.constant 9.99999974E-6 : f32
    %16 = vector.broadcast %cst_8 : f32 to vector<16x1xf32>
    %17 = arith.addf %13, %16 : vector<16x1xf32>
    %18 = math.rsqrt %17 : vector<16x1xf32>
    %19 = vector.broadcast %18 : vector<16x1xf32> to vector<16x32xf32>
    %20 = arith.mulf %15, %19 : vector<16x32xf32>
    %21 = vector.broadcast %1 : vector<1x32xf32> to vector<16x32xf32>
    %22 = arith.mulf %20, %21 : vector<16x32xf32>
    %23 = vector.broadcast %2 : vector<1x32xf32> to vector<16x32xf32>
    %24 = arith.addf %22, %23 : vector<16x32xf32>
    %c0_9 = arith.constant 0 : index
    %c0_10 = arith.constant 0 : index
    %25 = vector.load %arg4[%c0_9, %c0_10] : memref<32x96xf32, #tpu.memory_space<vmem>>, vector<32x96xf32>
    %cst_11 = arith.constant dense<0.000000e+00> : vector<16x96xf32>
    %26 = tpu.matmul %24, %25, %cst_11 {dimension_numbers = #tpu.dot_dimension_numbers<[1], [0], [0], [1], [0, 0, 1, 1], [], []>} : vector<16x32xf32>, vector<32x96xf32>, vector<16x96xf32> -> vector<16x96xf32>
    %c0_12 = arith.constant 0 : index
    %c0_13 = arith.constant 0 : index
    %27 = vector.load %arg5[%c0_12, %c0_13] : memref<1x96xf32, #tpu.memory_space<vmem>>, vector<1x96xf32>
    %28 = vector.broadcast %27 : vector<1x96xf32> to vector<16x96xf32>
    %29 = arith.addf %26, %28 : vector<16x96xf32>
    %c0_14 = arith.constant 0 : index
    %c0_15 = arith.constant 0 : index
    %30 = vector.load %arg6[%c0_14, %c0_15] : memref<16x96xf32, #tpu.memory_space<vmem>>, vector<16x96xf32>
    tpu.vector_store %arg6[%c0_14, %c0_15], %29 {strides = array<i32>} : memref<16x96xf32, #tpu.memory_space<vmem>>, vector<16x96xf32>,
    return
  }
  func.func @transform_0(%arg0: i32) -> (i32, i32) {
    %c0_i32 = arith.constant 0 : i32
    %c0_i32_0 = arith.constant 0 : i32
    return %arg0, %c0_i32 : i32, i32
  }
  func.func @transform_1(%arg0: i32) -> (i32, i32) {
    %c0_i32 = arith.constant 0 : i32
    %c0_i32_0 = arith.constant 0 : i32
    %c0_i32_1 = arith.constant 0 : i32
    return %c0_i32, %c0_i32_0 : i32, i32
  }
  func.func @transform_2(%arg0: i32) -> (i32, i32) {
    %c0_i32 = arith.constant 0 : i32
    %c0_i32_0 = arith.constant 0 : i32
    %c0_i32_1 = arith.constant 0 : i32
    return %c0_i32, %c0_i32_0 : i32, i32
  }
  func.func @transform_3(%arg0: i32) -> (i32, i32) {
    %c0_i32 = arith.constant 0 : i32
    %c0_i32_0 = arith.constant 0 : i32
    %c0_i32_1 = arith.constant 0 : i32
    return %c0_i32, %c0_i32_0 : i32, i32
  }
  func.func @transform_4(%arg0: i32) -> (i32, i32) {
    %c0_i32 = arith.constant 0 : i32
    %c0_i32_0 = arith.constant 0 : i32
    %c0_i32_1 = arith.constant 0 : i32
    return %c0_i32, %c0_i32_0 : i32, i32
  }
  func.func @transform_5(%arg0: i32) -> (i32, i32) {
    %c0_i32 = arith.constant 0 : i32
    %c0_i32_0 = arith.constant 0 : i32
    return %arg0, %c0_i32 : i32, i32
  }
}

module attributes {stable_mosaic.version = 11 : i64} {
  func.func @_ln_qkv_kernel(%arg0: i32, %arg1: memref<16x32xf32, #tpu.memory_space<vmem>>, %arg2: memref<1x32xf32, #tpu.memory_space<vmem>>, %arg3: memref<1x32xf32, #tpu.memory_space<vmem>>, %arg4: memref<32x96xf32, #tpu.memory_space<vmem>>, %arg5: memref<1x96xf32, #tpu.memory_space<vmem>>, %arg6: memref<16x96xf32, #tpu.memory_space<vmem>>) attributes {dimension_semantics = [#tpu.dimension_semantics<parallel>], iteration_bounds = array<i64: 2>, scalar_prefetch = 0 : i64, scratch_operands = 0 : i64, tpu.core_type = #tpu.core_type<tc>, window_params = [{transform_indices = @transform_0, window_bounds = array<i64: 16, 32>}, {pipeline_mode = #tpu.pipeline_mode<synchronous>, transform_indices = @transform_1, window_bounds = array<i64: 1, 32>}, {pipeline_mode = #tpu.pipeline_mode<synchronous>, transform_indices = @transform_2, window_bounds = array<i64: 1, 32>}, {pipeline_mode = #tpu.pipeline_mode<synchronous>, transform_indices = @transform_3, window_bounds = array<i64: 32, 96>}, {pipeline_mode = #tpu.pipeline_mode<synchronous>, transform_indices = @transform_4, window_bounds = array<i64: 1, 96>}, {transform_indices = @transform_5, window_bounds = array<i64: 16, 96>}]} {
    %c0 = arith.constant 0 : index
    %c0_0 = arith.constant 0 : index
    %0 = vector.load %arg1[%c0, %c0_0] : memref<16x32xf32, #tpu.memory_space<vmem>>, vector<16x32xf32>
    %c0_1 = arith.constant 0 : index
    %c0_2 = arith.constant 0 : index
    %1 = vector.load %arg2[%c0_1, %c0_2] : memref<1x32xf32, #tpu.memory_space<vmem>>, vector<1x32xf32>
    %c0_3 = arith.constant 0 : index
    %c0_4 = arith.constant 0 : index
    %2 = vector.load %arg3[%c0_3, %c0_4] : memref<1x32xf32, #tpu.memory_space<vmem>>, vector<1x32xf32>
    %cst = arith.constant dense<0.000000e+00> : vector<16xf32>
    %3 = vector.multi_reduction <add>, %0, %cst [1] : vector<16x32xf32> to vector<16xf32>
    %4 = vector.shape_cast %3 : vector<16xf32> to vector<16x1xf32>
    %cst_5 = arith.constant 3.200000e+01 : f32
    %5 = vector.broadcast %cst_5 : f32 to vector<16x1xf32>
    %6 = arith.divf %4, %5 : vector<16x1xf32>
    %7 = vector.broadcast %6 : vector<16x1xf32> to vector<16x32xf32>
    %8 = arith.subf %0, %7 : vector<16x32xf32>
    %9 = arith.mulf %8, %8 : vector<16x32xf32>
    %cst_6 = arith.constant dense<0.000000e+00> : vector<16xf32>
    %10 = vector.multi_reduction <add>, %9, %cst_6 [1] : vector<16x32xf32> to vector<16xf32>
    %11 = vector.shape_cast %10 : vector<16xf32> to vector<16x1xf32>
    %cst_7 = arith.constant 3.200000e+01 : f32
    %12 = vector.broadcast %cst_7 : f32 to vector<16x1xf32>
    %13 = arith.divf %11, %12 : vector<16x1xf32>
    %14 = vector.broadcast %6 : vector<16x1xf32> to vector<16x32xf32>
    %15 = arith.subf %0, %14 : vector<16x32xf32>
    %cst_8 = arith.constant 9.99999974E-6 : f32
    %16 = vector.broadcast %cst_8 : f32 to vector<16x1xf32>
    %17 = arith.addf %13, %16 : vector<16x1xf32>
    %18 = math.rsqrt %17 : vector<16x1xf32>
    %19 = vector.broadcast %18 : vector<16x1xf32> to vector<16x32xf32>
    %20 = arith.mulf %15, %19 : vector<16x32xf32>
    %21 = vector.broadcast %1 : vector<1x32xf32> to vector<16x32xf32>
    %22 = arith.mulf %20, %21 : vector<16x32xf32>
    %23 = vector.broadcast %2 : vector<1x32xf32> to vector<16x32xf32>
    %24 = arith.addf %22, %23 : vector<16x32xf32>
    %c0_9 = arith.constant 0 : index
    %c0_10 = arith.constant 0 : index
    %25 = vector.load %arg4[%c0_9, %c0_10] : memref<32x96xf32, #tpu.memory_space<vmem>>, vector<32x96xf32>
    %cst_11 = arith.constant dense<0.000000e+00> : vector<16x96xf32>
    %26 = tpu.matmul %24, %25, %cst_11 {dimension_numbers = #tpu.dot_dimension_numbers<[1], [0], [0], [1], [0, 0, 1, 1], [], []>} : vector<16x32xf32>, vector<32x96xf32>, vector<16x96xf32> -> vector<16x96xf32>
    %c0_12 = arith.constant 0 : index
    %c0_13 = arith.constant 0 : index
    %27 = vector.load %arg5[%c0_12, %c0_13] : memref<1x96xf32, #tpu.memory_space<vmem>>, vector<1x96xf32>
    %28 = vector.broadcast %27 : vector<1x96xf32> to vector<16x96xf32>
    %29 = arith.addf %26, %28 : vector<16x96xf32>
    %c0_14 = arith.constant 0 : index
    %c0_15 = arith.constant 0 : index
    %30 = vector.load %arg6[%c0_14, %c0_15] : memref<16x96xf32, #tpu.memory_space<vmem>>, vector<16x96xf32>
    tpu.vector_store %arg6[%c0_14, %c0_15], %29 {strides = array<i32>} : memref<16x96xf32, #tpu.memory_space<vmem>>, vector<16x96xf32>,
    return
  }
  func.func @transform_0(%arg0: i32) -> (i32, i32) {
    %c0_i32 = arith.constant 0 : i32
    %c0_i32_0 = arith.constant 0 : i32
    return %arg0, %c0_i32 : i32, i32
  }
  func.func @transform_1(%arg0: i32) -> (i32, i32) {
    %c0_i32 = arith.constant 0 : i32
    %c0_i32_0 = arith.constant 0 : i32
    %c0_i32_1 = arith.constant 0 : i32
    return %c0_i32, %c0_i32_0 : i32, i32
  }
  func.func @transform_2(%arg0: i32) -> (i32, i32) {
    %c0_i32 = arith.constant 0 : i32
    %c0_i32_0 = arith.constant 0 : i32
    %c0_i32_1 = arith.constant 0 : i32
    return %c0_i32, %c0_i32_0 : i32, i32
  }
  func.func @transform_3(%arg0: i32) -> (i32, i32) {
    %c0_i32 = arith.constant 0 : i32
    %c0_i32_0 = arith.constant 0 : i32
    %c0_i32_1 = arith.constant 0 : i32
    return %c0_i32, %c0_i32_0 : i32, i32
  }
  func.func @transform_4(%arg0: i32) -> (i32, i32) {
    %c0_i32 = arith.constant 0 : i32
    %c0_i32_0 = arith.constant 0 : i32
    %c0_i32_1 = arith.constant 0 : i32
    return %c0_i32, %c0_i32_0 : i32, i32
  }
  func.func @transform_5(%arg0: i32) -> (i32, i32) {
    %c0_i32 = arith.constant 0 : i32
    %c0_i32_0 = arith.constant 0 : i32
    return %arg0, %c0_i32 : i32, i32
  }
}

module attributes {stable_mosaic.version = 11 : i64} {
  func.func @_attn_mlp_res_kernel(%arg0: i32, %arg1: memref<16x32xf32, #tpu.memory_space<vmem>>, %arg2: memref<16x32xf32, #tpu.memory_space<vmem>>, %arg3: memref<32x32xf32, #tpu.memory_space<vmem>>, %arg4: memref<1x32xf32, #tpu.memory_space<vmem>>, %arg5: memref<1x32xf32, #tpu.memory_space<vmem>>, %arg6: memref<1x32xf32, #tpu.memory_space<vmem>>, %arg7: memref<32x128xf32, #tpu.memory_space<vmem>>, %arg8: memref<1x128xf32, #tpu.memory_space<vmem>>, %arg9: memref<128x32xf32, #tpu.memory_space<vmem>>, %arg10: memref<1x32xf32, #tpu.memory_space<vmem>>, %arg11: memref<16x32xf32, #tpu.memory_space<vmem>>) attributes {dimension_semantics = [#tpu.dimension_semantics<parallel>], iteration_bounds = array<i64: 2>, scalar_prefetch = 0 : i64, scratch_operands = 0 : i64, tpu.core_type = #tpu.core_type<tc>, window_params = [{transform_indices = @transform_0, window_bounds = array<i64: 16, 32>}, {transform_indices = @transform_1, window_bounds = array<i64: 16, 32>}, {pipeline_mode = #tpu.pipeline_mode<synchronous>, transform_indices = @transform_2, window_bounds = array<i64: 32, 32>}, {pipeline_mode = #tpu.pipeline_mode<synchronous>, transform_indices = @transform_3, window_bounds = array<i64: 1, 32>}, {pipeline_mode = #tpu.pipeline_mode<synchronous>, transform_indices = @transform_4, window_bounds = array<i64: 1, 32>}, {pipeline_mode = #tpu.pipeline_mode<synchronous>, transform_indices = @transform_5, window_bounds = array<i64: 1, 32>}, {pipeline_mode = #tpu.pipeline_mode<synchronous>, transform_indices = @transform_6, window_bounds = array<i64: 32, 128>}, {pipeline_mode = #tpu.pipeline_mode<synchronous>, transform_indices = @transform_7, window_bounds = array<i64: 1, 128>}, {pipeline_mode = #tpu.pipeline_mode<synchronous>, transform_indices = @transform_8, window_bounds = array<i64: 128, 32>}, {pipeline_mode = #tpu.pipeline_mode<synchronous>, transform_indices = @transform_9, window_bounds = array<i64: 1, 32>}, {transform_indices = @transform_10, window_bounds = array<i64: 16, 32>}]} {
    %c0 = arith.constant 0 : index
    %c0_0 = arith.constant 0 : index
    %0 = vector.load %arg1[%c0, %c0_0] : memref<16x32xf32, #tpu.memory_space<vmem>>, vector<16x32xf32>
    %c0_1 = arith.constant 0 : index
    %c0_2 = arith.constant 0 : index
    %1 = vector.load %arg2[%c0_1, %c0_2] : memref<16x32xf32, #tpu.memory_space<vmem>>, vector<16x32xf32>
    %c0_3 = arith.constant 0 : index
    %c0_4 = arith.constant 0 : index
    %2 = vector.load %arg3[%c0_3, %c0_4] : memref<32x32xf32, #tpu.memory_space<vmem>>, vector<32x32xf32>
    %cst = arith.constant dense<0.000000e+00> : vector<16x32xf32>
    %3 = tpu.matmul %0, %2, %cst {dimension_numbers = #tpu.dot_dimension_numbers<[1], [0], [0], [1], [0, 0, 1, 1], [], []>} : vector<16x32xf32>, vector<32x32xf32>, vector<16x32xf32> -> vector<16x32xf32>
    %4 = arith.addf %1, %3 : vector<16x32xf32>
    %c0_5 = arith.constant 0 : index
    %c0_6 = arith.constant 0 : index
    %5 = vector.load %arg4[%c0_5, %c0_6] : memref<1x32xf32, #tpu.memory_space<vmem>>, vector<1x32xf32>
    %6 = vector.broadcast %5 : vector<1x32xf32> to vector<16x32xf32>
    %7 = arith.addf %4, %6 : vector<16x32xf32>
    %c0_7 = arith.constant 0 : index
    %c0_8 = arith.constant 0 : index
    %8 = vector.load %arg5[%c0_7, %c0_8] : memref<1x32xf32, #tpu.memory_space<vmem>>, vector<1x32xf32>
    %c0_9 = arith.constant 0 : index
    %c0_10 = arith.constant 0 : index
    %9 = vector.load %arg6[%c0_9, %c0_10] : memref<1x32xf32, #tpu.memory_space<vmem>>, vector<1x32xf32>
    %cst_11 = arith.constant dense<0.000000e+00> : vector<16xf32>
    %10 = vector.multi_reduction <add>, %7, %cst_11 [1] : vector<16x32xf32> to vector<16xf32>
    %11 = vector.shape_cast %10 : vector<16xf32> to vector<16x1xf32>
    %cst_12 = arith.constant 3.200000e+01 : f32
    %12 = vector.broadcast %cst_12 : f32 to vector<16x1xf32>
    %13 = arith.divf %11, %12 : vector<16x1xf32>
    %14 = vector.broadcast %13 : vector<16x1xf32> to vector<16x32xf32>
    %15 = arith.subf %7, %14 : vector<16x32xf32>
    %16 = arith.mulf %15, %15 : vector<16x32xf32>
    %cst_13 = arith.constant dense<0.000000e+00> : vector<16xf32>
    %17 = vector.multi_reduction <add>, %16, %cst_13 [1] : vector<16x32xf32> to vector<16xf32>
    %18 = vector.shape_cast %17 : vector<16xf32> to vector<16x1xf32>
    %cst_14 = arith.constant 3.200000e+01 : f32
    %19 = vector.broadcast %cst_14 : f32 to vector<16x1xf32>
    %20 = arith.divf %18, %19 : vector<16x1xf32>
    %21 = vector.broadcast %13 : vector<16x1xf32> to vector<16x32xf32>
    %22 = arith.subf %7, %21 : vector<16x32xf32>
    %cst_15 = arith.constant 9.99999974E-6 : f32
    %23 = vector.broadcast %cst_15 : f32 to vector<16x1xf32>
    %24 = arith.addf %20, %23 : vector<16x1xf32>
    %25 = math.rsqrt %24 : vector<16x1xf32>
    %26 = vector.broadcast %25 : vector<16x1xf32> to vector<16x32xf32>
    %27 = arith.mulf %22, %26 : vector<16x32xf32>
    %28 = vector.broadcast %8 : vector<1x32xf32> to vector<16x32xf32>
    %29 = arith.mulf %27, %28 : vector<16x32xf32>
    %30 = vector.broadcast %9 : vector<1x32xf32> to vector<16x32xf32>
    %31 = arith.addf %29, %30 : vector<16x32xf32>
    %cst_16 = arith.constant 0.000000e+00 : f32
    %32 = vector.broadcast %cst_16 : f32 to vector<16x32xf32>
    %c0_17 = arith.constant 0 : index
    %c0_18 = arith.constant 0 : index
    %33 = vector.load %arg7[%c0_17, %c0_18] : memref<32x128xf32, #tpu.memory_space<vmem>>, vector<32x128xf32>
    %cst_19 = arith.constant dense<0.000000e+00> : vector<16x128xf32>
    %34 = tpu.matmul %31, %33, %cst_19 {dimension_numbers = #tpu.dot_dimension_numbers<[1], [0], [0], [1], [0, 0, 1, 1], [], []>} : vector<16x32xf32>, vector<32x128xf32>, vector<16x128xf32> -> vector<16x128xf32>
    %c0_20 = arith.constant 0 : index
    %c0_21 = arith.constant 0 : index
    %35 = vector.load %arg8[%c0_20, %c0_21] : memref<1x128xf32, #tpu.memory_space<vmem>>, vector<1x128xf32>
    %36 = vector.broadcast %35 : vector<1x128xf32> to vector<16x128xf32>
    %37 = arith.addf %34, %36 : vector<16x128xf32>
    %cst_22 = arith.constant 5.000000e-01 : f32
    %38 = vector.broadcast %cst_22 : f32 to vector<16x128xf32>
    %39 = arith.mulf %38, %37 : vector<16x128xf32>
    %cst_23 = arith.constant 0.707106769 : f32
    %40 = vector.broadcast %cst_23 : f32 to vector<16x128xf32>
    %41 = arith.mulf %37, %40 : vector<16x128xf32>
    %42 = math.erf %41 : vector<16x128xf32>
    %cst_24 = arith.constant 1.000000e+00 : f32
    %43 = vector.broadcast %cst_24 : f32 to vector<16x128xf32>
    %44 = arith.addf %43, %42 : vector<16x128xf32>
    %45 = arith.mulf %39, %44 : vector<16x128xf32>
    %c0_25 = arith.constant 0 : index
    %c0_26 = arith.constant 0 : index
    %46 = vector.load %arg9[%c0_25, %c0_26] : memref<128x32xf32, #tpu.memory_space<vmem>>, vector<128x32xf32>
    %cst_27 = arith.constant dense<0.000000e+00> : vector<16x32xf32>
    %47 = tpu.matmul %45, %46, %cst_27 {dimension_numbers = #tpu.dot_dimension_numbers<[1], [0], [0], [1], [0, 0, 1, 1], [], []>} : vector<16x128xf32>, vector<128x32xf32>, vector<16x32xf32> -> vector<16x32xf32>
    %48 = arith.addf %32, %47 : vector<16x32xf32>
    %49 = arith.addf %7, %48 : vector<16x32xf32>
    %c0_28 = arith.constant 0 : index
    %c0_29 = arith.constant 0 : index
    %50 = vector.load %arg10[%c0_28, %c0_29] : memref<1x32xf32, #tpu.memory_space<vmem>>, vector<1x32xf32>
    %51 = vector.broadcast %50 : vector<1x32xf32> to vector<16x32xf32>
    %52 = arith.addf %49, %51 : vector<16x32xf32>
    %c0_30 = arith.constant 0 : index
    %c0_31 = arith.constant 0 : index
    %53 = vector.load %arg11[%c0_30, %c0_31] : memref<16x32xf32, #tpu.memory_space<vmem>>, vector<16x32xf32>
    tpu.vector_store %arg11[%c0_30, %c0_31], %52 {strides = array<i32>} : memref<16x32xf32, #tpu.memory_space<vmem>>, vector<16x32xf32>,
    return
  }
  func.func @transform_0(%arg0: i32) -> (i32, i32) {
    %c0_i32 = arith.constant 0 : i32
    %c0_i32_0 = arith.constant 0 : i32
    return %arg0, %c0_i32 : i32, i32
  }
  func.func @transform_1(%arg0: i32) -> (i32, i32) {
    %c0_i32 = arith.constant 0 : i32
    %c0_i32_0 = arith.constant 0 : i32
    return %arg0, %c0_i32 : i32, i32
  }
  func.func @transform_2(%arg0: i32) -> (i32, i32) {
    %c0_i32 = arith.constant 0 : i32
    %c0_i32_0 = arith.constant 0 : i32
    %c0_i32_1 = arith.constant 0 : i32
    return %c0_i32, %c0_i32_0 : i32, i32
  }
  func.func @transform_3(%arg0: i32) -> (i32, i32) {
    %c0_i32 = arith.constant 0 : i32
    %c0_i32_0 = arith.constant 0 : i32
    %c0_i32_1 = arith.constant 0 : i32
    return %c0_i32, %c0_i32_0 : i32, i32
  }
  func.func @transform_4(%arg0: i32) -> (i32, i32) {
    %c0_i32 = arith.constant 0 : i32
    %c0_i32_0 = arith.constant 0 : i32
    %c0_i32_1 = arith.constant 0 : i32
    return %c0_i32, %c0_i32_0 : i32, i32
  }
  func.func @transform_5(%arg0: i32) -> (i32, i32) {
    %c0_i32 = arith.constant 0 : i32
    %c0_i32_0 = arith.constant 0 : i32
    %c0_i32_1 = arith.constant 0 : i32
    return %c0_i32, %c0_i32_0 : i32, i32
  }
  func.func @transform_6(%arg0: i32) -> (i32, i32) {
    %c0_i32 = arith.constant 0 : i32
    %c0_i32_0 = arith.constant 0 : i32
    %c0_i32_1 = arith.constant 0 : i32
    return %c0_i32, %c0_i32_0 : i32, i32
  }
  func.func @transform_7(%arg0: i32) -> (i32, i32) {
    %c0_i32 = arith.constant 0 : i32
    %c0_i32_0 = arith.constant 0 : i32
    %c0_i32_1 = arith.constant 0 : i32
    return %c0_i32, %c0_i32_0 : i32, i32
  }
  func.func @transform_8(%arg0: i32) -> (i32, i32) {
    %c0_i32 = arith.constant 0 : i32
    %c0_i32_0 = arith.constant 0 : i32
    %c0_i32_1 = arith.constant 0 : i32
    return %c0_i32, %c0_i32_0 : i32, i32
  }
  func.func @transform_9(%arg0: i32) -> (i32, i32) {
    %c0_i32 = arith.constant 0 : i32
    %c0_i32_0 = arith.constant 0 : i32
    %c0_i32_1 = arith.constant 0 : i32
    return %c0_i32, %c0_i32_0 : i32, i32
  }
  func.func @transform_10(%arg0: i32) -> (i32, i32) {
    %c0_i32 = arith.constant 0 : i32
    %c0_i32_0 = arith.constant 0 : i32
    return %arg0, %c0_i32 : i32, i32
  }
}

</mosaic_0001>

<bundles_post_ra>
// kernel: contour_transformer_pallas.4
= control target key start
LH: loop header
LB: loop body
LE: loop exit
PB: predicated region body
PF: predicated region fallthrough
CT: control target
= control target key end

     0   :  { %10 = vsyncpa [#allocation3], 0  ;;  %s794_s0 = inlined_call_operand.hbm [shape: f32[32,32], index: 0, kind: input, shape index: {}]   ;;  %s795_s1 = inlined_call_operand.vmem [shape: f32[1,32], index: 1, kind: input, shape index: {}]   ;;  %s796_s2 = inlined_call_operand.vmem [shape: f32[1,32], index: 2, kind: input, shape index: {}]   ;;  %s797_s3 = inlined_call_operand.hbm [shape: f32[32,96], index: 3, kind: input, shape index: {}]   ;;  %s798_s4 = inlined_call_operand.vmem [shape: f32[1,96], index: 4, kind: input, shape index: {}]   ;;  %s799_s5 = inlined_call_operand.vmem [shape: f32[32,96], index: 5, kind: output, shape index: {}]  }
   0x1   :  { %12 = vsyncpa [#allocation3 + $0x1], 0 }
   0x2   :  { %13 = vsyncpa [#allocation5], 0  ;;  %s667_s18 = smov 0   ;;  %s669_s19 = smov 0  }
   0x3   :  { %s671_s20 = smov 0   ;;  %s673_s21 = smov 0  }
   0x4 LB: > { %s449_s22 = sadd.s32 4294967295, %s631_s21   ;;  %p39_p0 = scmp.ne.s32.totalorder %s623_s19, %s619_s18  ;;  %s631_s21 = sphi %s673_s21, %s807_s21   ;;  %s627_s20 = sphi %s671_s20, %s806_s20   ;;  %s623_s19 = sphi %s669_s19, %s805_s19   ;;  %s619_s18 = sphi %s667_s18, %s804_s18  }
   0x5   : > { %p689_p1 = scmp.eq.s32.totalorder %s449_s22, 0  ;;  %p451_p2 = scmp.ge.s32.totalorder %s631_s21, 1 }
   0x6   : > { %p160_p3 = scmp.lt.s32.totalorder %s631_s21, 3  ;;  %s177_s27 = sshll.u32 %s797_s3, 4  ;;  %s178_s27 = int_to_ptr.hbm [resolvable:$true] %s177_s27 }
   0x7   : > { %p697_p4 = por %p689_p1, %p39_p0  ;;  %s633_s29 = smov [#allocation4]  }
   0x8   : > { %p704_p5 = pnand %p451_p2, %p160_p3  ;;  %s179_s30 = sshll.u32 %s633_s29, 4  ;;  %s180_s30 = int_to_ptr.vmem [resolvable:$true] %s179_s30 }
   0x9   : > { %s713_s6 = sadd.s32 1, %s631_s21   ;;  %s634_s7 = smov 128  }
   0xa   : > { %p477_p6 = pneg %p704_p5  ;;  %s635_s8 = smov 8  }
   0xb   : > { %s23_s9 = ssub.s32 %s631_s21, %s713_s6  ;;  %s26_s10 = sadd.s32 1, %s627_s20 }
   0xc   : > { %p478_p7 = pnand %p477_p6, %p689_p1  ;;  %p24_p8 = scmp.eq.s32.totalorder %s23_s9, 0 }
   0xd   : > { %p33_p9 = scmp.ne.s32.totalorder %s627_s20, %s623_s19  ;;  %p34_p10 = scmp.eq.s32.totalorder %s631_s21, 0 }
   0xe   : > { %480 = dma.hbm_to_vmem [thread:$0]  (!%p478_p7), %s178_s27, 512, %s180_s30, [#allocation5], %s634_s7, %s634_s7, %s635_s8  }
   0xf   : > { %p486_p11 = scmp.lt.s32.totalorder %s631_s21, 2  ;;  %p35_p12 = por %p34_p10, %p33_p9 }
  0x10   : > { %s726_s11 = scalar_select %p24_p8, %s627_s20, %s26_s10  }
  0x11   : > { %s196_s12 = sand.u32 1, %s627_s20   ;;  %s466_s14 = sshll.u32 %s631_s21, 4 }
  0x12   : > { %s454_s13 = sshll.u32 %s196_s12, 4  ;;  %s205_s17 = scalar_lea.hbm %s794_s0, %s466_s14 }
  0x13   : > { %s200_s18 = scalar_lea.vmem [#allocation2], %s454_s13  ;;  %s206_s26 = sshll.u32 %s205_s17, 4  ;;  %s207_s26 = int_to_ptr.hbm [resolvable:$true] %s206_s26 }
  0x14   : > { %s208_s25 = sshll.u32 %s200_s18, 4  ;;  %p733_p13 = pnand %p486_p11, %p35_p12  ;;  %s209_s25 = int_to_ptr.vmem [resolvable:$true] %s208_s25 }
  0x15   : > { %s197_s29 = scalar_lea.sflag [#allocation3], %s196_s12  ;;  %s563_s30 = sshra.s32 %s207_s26, 4  ;;  %s564_s30 = int_to_ptr.hbm [resolvable:$true] %s563_s30 }
  0x16   : > { %s565_s9 = scalar_lea.hbm %s564_s30, 16  ;;  %p567_p2 = pneg %p733_p13 }
  0x17   : > { %p566_p0 = scmp.ne.s32.totalorder %s564_s30, %s565_s9  ;;  %s570_s14 = scalar_lea.hbm %s794_s0, 32 }
  0x18   : > { %p571_p7 = scmp.lt.s32.totalorder %s564_s30, %s794_s0  ;;  %p572_p8 = scmp.lt.s32.totalorder %s570_s14, %s565_s9 }
  0x19   : > { %p568_p3 = pnand %p567_p2, %p566_p0 }
  0x1a   : > { %p573_p9 = por %p572_p8, %p571_p7 }
  0x1b   : > { %p569_p6 = pneg %p568_p3 }
  0x1d   : > { %p574_p10 = pnand %p573_p9, %p569_p6 }
  0x1f   : > { %577 = shalt.err (!%p574_p10)
}
  0x20   : > { %484 = dma.hbm_to_vmem [thread:$0]  (!%p733_p13), %s207_s26, 256, %s209_s25, %s197_s29, %s634_s7, %s634_s7, %s635_s8  }
  0x21   : > { %220 = sbr.rel (%p704_p5) target bundleno = 447 (0x1bf), region = 40  ;;  %s222_s12 = sand.u32 (!%p704_p5), 1, %s623_s19  }
  0x22   : > { %s458_s17 = sshll.u32 (!%p704_p5), %s222_s12, 4  ;;  %s223_s18 = scalar_lea.sflag (!%p704_p5), [#allocation3], %s222_s12 }
  0x23   : > { %s226_s10 = scalar_lea.vmem (!%p704_p5), [#allocation2], %s458_s17 }
  0x26   : > { %610 = dma.done.wait (%p697_p4), %s223_s18, 256  }
  0x27   : > { %612 = vsyncadd (%p697_p4), %s223_s18, 4294967040 }
  0x28   : > { %614 = dma.done.wait (%p689_p1), [#allocation5], 512  }
  0x29   : > { %616 = vsyncadd (%p689_p1), [#allocation5], 4294966784  ;;  %vm270_vm0 = vcmask 261120   ;;  %v266_v0 = vld [vmem:[%s226_s10] sm:$0xff]  ;;  %v267_v2 = vld [vmem:[%s226_s10 + $0x8] sm:$0xff]  ;;  %v636_v4 = vmov 32.0  }
  0x2a   : > { %v271_v1 = vsel %vm270_vm0, %v266_v0, 0.0  ;;  %v274_v3 = vsel %vm270_vm0, %v267_v2, 0.0  ;;  %527 = vrcp.f32 %v636_v4  ;;  %v335_v21 = vld [vmem:[#allocation4 + $0x18] sm:$0xff]  ;;  %v334_v22 = vld [vmem:[#allocation4 + $0x10] sm:$0xff]  ;;  %v333_v23 = vld [vmem:[#allocation4 + $0x8] sm:$0xff]  ;;  %s460_s8 = sshll.u32 %s449_s22, 1 }
  0x2b   : > { %272 = vadd.xlane.f32.xlu0 %v271_v1  ;;  %358 = vmatpush.msra.mxu0 %v335_v21  ;;  %v332_v24 = vld [vmem:[#allocation4] sm:$0xff]  ;;  %p261_p1 = scmp.lt.s32.totalorder %s460_s8, 3  ;;  %vm369_vm8 = vcmask 785408  }
  0x2c   : > { %467 = vmatpush.msra.mxu1 %v335_v21  ;;  %v524_v39 = vld [vmem:[%s795_s1] ss:$0 sm:$0xff] }
  0x2d   : > { %359 = vmatpush.msra.mxu0 %v334_v22  ;;  %v525_v43 = vld [vmem:[%s796_s2] ss:$0 sm:$0xff]  ;;  %s809_s8 = smov (!%p261_p1, %s460_s8), 3 }
  0x2e   : > { %468 = vmatpush.msra.mxu1 %v334_v22  ;;  %s461_s25 = sshll.u32 %s809_s8, 3  ;;  %v526_v53 = vld [vmem:[%s798_s4] ss:$0 sm:$0xff] }
  0x2f   : > { %360 = vmatpush.msra.mxu0 %v333_v23  ;;  %s264_s9 = scalar_lea.vmem %s799_s5, %s461_s25 }
  0x30   : > { %v528_v5 = vpop.eup %527  ;;  %469 = vmatpush.msra.mxu1 %v333_v23 }
  0x31   : > { %v278_v6 = vmul.f32 32.0, %v528_v5  ;;  %vm282_vm1 = vweird.f32 %v528_v5  ;;  %361 = vmatpush.msra.mxu0 %v332_v24 }
  0x32   : > { %470 = vmatpush.msra.mxu1 %v332_v24 }
  0x33   : > { %275 = vadd.xlane.f32.xlu0 %v274_v3  ;;  %v279_v7 = vsub.f32 1.0, %v278_v6 }
  0x35   : > { %v280_v8 = vmul.f32 %v528_v5, %v279_v7 }
  0x37   : > { %v281_v9 = vadd.f32 %v528_v5, %v280_v8 }
  0x39   : > { %v283_v10 = vsel %vm282_vm1, %v528_v5, %v281_v9 }
  0x9e   : > { %v273_v11 = vpop.xlane.xlu0 %272 }
  0x9f   : > { %v284_v12 = vmul.f32 %v283_v10, %v273_v11 }
  0xa1   : > { %v286_v13 = vsub.f32 %v266_v0, %v284_v12 }
  0xa3   : > { %v288_v14 = vmul.f32 %v286_v13, %v286_v13 }
  0xa5   : > { %v290_v15 = vsel %vm270_vm0, %v288_v14, 0.0 }
  0xa6   : > { %291 = vadd.xlane.f32.xlu1 %v290_v15  ;;  %v276_v16 = vpop.xlane.xlu0 %275 }
  0xa7   : > { %v285_v17 = vmul.f32 %v283_v10, %v276_v16 }
  0xa9   : > { %v287_v18 = vsub.f32 %v267_v2, %v285_v17 }
  0xab   : > { %v289_v19 = vmul.f32 %v287_v18, %v287_v18 }
  0xad   : > { %v293_v20 = vsel %vm270_vm0, %v289_v19, 0.0 }
  0xae   : > { %294 = vadd.xlane.f32.xlu1 %v293_v20 }
 0x119   : > { %v292_v25 = vpop.xlane.xlu1 %291 }
 0x11a   : > { %v296_v26 = vmul.f32 %v292_v25, %v283_v10 }
 0x11c   : > { %v298_v27 = vadd.f32 1e-05, %v296_v26 }
 0x11e   : > { %529 = vrsqrt.f32 %v298_v27  ;;  %vm306_vm3 = vweird.f32 %v298_v27 }
 0x121   : > { %v295_v28 = vpop.xlane.xlu1 %294 }
 0x122   : > { %v297_v29 = vmul.f32 %v295_v28, %v283_v10 }
 0x124   : > { %v530_v30 = vpop.eup %529  ;;  %v299_v31 = vadd.f32 1e-05, %v297_v29 }
 0x125   : > { %v301_v32 = vmul.f32 %v530_v30, %v298_v27  ;;  %vm307_vm2 = vweird.f32 %v530_v30 }
 0x126   : > { %531 = vrsqrt.f32 %v299_v31  ;;  %vm308_vm4 = vmor %vm306_vm3, %vm307_vm2  ;;  %vm316_vm6 = vweird.f32 %v299_v31 }
 0x127   : > { %v302_v33 = vmul.f32 %v530_v30, %v301_v32 }
 0x129   : > { %v303_v34 = vmul.f32 0.5, %v302_v33 }
 0x12b   : > { %v304_v35 = vsub.f32 1.5, %v303_v34 }
 0x12c   : > { %v532_v36 = vpop.eup %531 }
 0x12d   : > { %v305_v37 = vmul.f32 %v530_v30, %v304_v35  ;;  %v311_v38 = vmul.f32 %v532_v36, %v299_v31  ;;  %vm317_vm5 = vweird.f32 %v532_v36 }
 0x12e   : > { %vm318_vm7 = vmor %vm316_vm6, %vm317_vm5 }
 0x12f   : > { %v309_v40 = vsel %vm308_vm4, %v530_v30, %v305_v37  ;;  %v312_v41 = vmul.f32 %v532_v36, %v311_v38 }
 0x130   : > { %v320_v42 = vmul.f32 %v309_v40, %v286_v13 }
 0x131   : > { %v313_v44 = vmul.f32 0.5, %v312_v41 }
 0x132   : > { %v325_v45 = vmul.f32 %v524_v39, %v320_v42 }
 0x133   : > { %v314_v46 = vsub.f32 1.5, %v313_v44 }
 0x134   : > { %v330_v47 = vadd.f32 %v525_v43, %v325_v45 }
 0x135   : > { %v315_v48 = vmul.f32 %v532_v36, %v314_v46 }
 0x136   : > { %462 = vmatmul.msk.f32.vlgmr.msra.gmra.mxu0 %vm270_vm0, %v330_v47 }
 0x137   : > { %v319_v49 = vsel %vm318_vm7, %v532_v36, %v315_v48 }
 0x138   : > { %v321_v50 = vmul.f32 %v319_v49, %v287_v18 }
 0x13a   : > { %v326_v51 = vmul.f32 %v524_v39, %v321_v50 }
 0x13c   : > { %v331_v52 = vadd.f32 %v525_v43, %v326_v51 }
 0x13e   : > { %463 = vmatmul.msk.f32.vlgmr.msra.gmra.mxu1 %vm270_vm0, %v331_v52 }
 0x1b3   : > { %v363_v54 = vpop.f32.mrf.mxu0 }
 0x1b4   : > { %v364_v55 = vadd.f32 %v526_v53, %v363_v54 }
 0x1b6   : > { %370 = vst.msk [vmem:[%s264_s9] sm:$0xff] %vm369_vm8, %v364_v55 }
 0x1bb   : > { %v366_v56 = vpop.f32.mrf.mxu1 }
 0x1bc   : > { %v367_v57 = vadd.f32 %v526_v53, %v366_v56 }
 0x1be   : > { %371 = vst.msk [vmem:[%s264_s9 + $0x8] sm:$0xff] %vm369_vm8, %v367_v57 }
 0x1bf PF: > { %p16_p4 = scmp.ge.s32.totalorder %s713_s6, 4   ;;  %s804_s18 = smov %s623_s19 }
 0x1c0   : > { %s805_s19 = smov %s627_s20  ;;  %s806_s20 = smov %s726_s11 }
 0x1c1   : > { %s807_s21 = smov %s713_s6  ;;  %18 = sbr.rel (!%p16_p4) target bundleno = 4 (0x4), region = 84 }
 0x1c6   :  { %394 = vsyncpa [#allocation3], 1 }
 0x1c7   :  { %396 = vsyncpa [#allocation3 + $0x1], 1 }
 0x1c8   :  { %397 = vsyncpa [#allocation5], 1 }

// kernel: contour_transformer_pallas.6
= control target key start
LH: loop header
LB: loop body
LE: loop exit
PB: predicated region body
PF: predicated region fallthrough
CT: control target
= control target key end

     0   :  { %s464_s18 = smov 0   ;;  %s515_s0 = inlined_call_operand.vmem [shape: f32[32,32], index: 0, kind: input, shape index: {}]   ;;  %s516_s1 = inlined_call_operand.vmem [shape: f32[1,32], index: 1, kind: input, shape index: {}]   ;;  %s517_s2 = inlined_call_operand.vmem [shape: f32[1,32], index: 2, kind: input, shape index: {}]   ;;  %s518_s3 = inlined_call_operand.vmem [shape: f32[32,96], index: 3, kind: input, shape index: {}]   ;;  %s519_s4 = inlined_call_operand.vmem [shape: f32[1,96], index: 4, kind: input, shape index: {}]   ;;  %s520_s5 = inlined_call_operand.vmem [shape: f32[32,96], index: 5, kind: output, shape index: {}]  }
   0x1 LB: > { %s390_s19 = sadd.s32 4294967295, %s431_s18   ;;  %p394_p0 = scmp.ge.s32.totalorder %s431_s18, 1  ;;  %s431_s18 = sphi %s464_s18, %s15_s18  }
   0x2   : > { %p188_p1 = scmp.lt.s32.totalorder %s431_s18, 3 }
   0x4   : > { %p189_p2 = pnand %p394_p0, %p188_p1 }
   0x5   : > { %s395_s20 = sshll.u32 (!%p189_p2), %s390_s19, 1 }
   0x6   : > { %192 = sbr.rel (%p189_p2) target bundleno = 420 (0x1a4), region = 40  ;;  %p217_p3 = scmp.lt.s32.totalorder (!%p189_p2), %s395_s20, 3 }
   0xb   : > { %s522_s20 = smov (!%p217_p3, %s395_s20), 3  ;;  %vm232_vm0 = vcmask 261120   ;;  %v433_v4 = vmov 32.0   ;;  %v297_v21 = vld [vmem:[%s518_s3 + $0x18] sm:$0xff]  ;;  %v296_v22 = vld [vmem:[%s518_s3 + $0x10] sm:$0xff]  ;;  %v295_v23 = vld [vmem:[%s518_s3 + $0x8] sm:$0xff] }
   0xc   : > { %s396_s21 = sshll.u32 %s522_s20, 3  ;;  %419 = vrcp.f32 %v433_v4  ;;  %320 = vmatpush.msra.mxu0 %v297_v21  ;;  %403 = vmatpush.msra.mxu1 %v297_v21  ;;  %v294_v24 = vld [vmem:[%s518_s3] sm:$0xff]  ;;  %vm331_vm8 = vcmask 785408  }
   0xd   : > { %s220_s24 = scalar_lea.vmem %s515_s0, %s396_s21  ;;  %v416_v39 = vld [vmem:[%s516_s1] ss:$0 sm:$0xff]  ;;  %s226_s16 = scalar_lea.vmem %s520_s5, %s396_s21 }
   0xe   : > { %v228_v0 = vld [vmem:[%s220_s24] sm:$0xff]  ;;  %v229_v2 = vld [vmem:[%s220_s24 + $0x8] sm:$0xff]  ;;  %321 = vmatpush.msra.mxu0 %v296_v22  ;;  %404 = vmatpush.msra.mxu1 %v296_v22 }
   0xf   : > { %v233_v1 = vsel %vm232_vm0, %v228_v0, 0.0  ;;  %v236_v3 = vsel %vm232_vm0, %v229_v2, 0.0  ;;  %v417_v43 = vld [vmem:[%s517_s2] ss:$0 sm:$0xff] }
  0x10   : > { %234 = vadd.xlane.f32.xlu0 %v233_v1  ;;  %322 = vmatpush.msra.mxu0 %v295_v23  ;;  %v418_v53 = vld [vmem:[%s519_s4] ss:$0 sm:$0xff] }
  0x11   : > { %405 = vmatpush.msra.mxu1 %v295_v23 }
  0x12   : > { %v420_v5 = vpop.eup %419  ;;  %323 = vmatpush.msra.mxu0 %v294_v24 }
  0x13   : > { %v240_v6 = vmul.f32 32.0, %v420_v5  ;;  %vm244_vm1 = vweird.f32 %v420_v5  ;;  %406 = vmatpush.msra.mxu1 %v294_v24 }
  0x15   : > { %v241_v7 = vsub.f32 1.0, %v240_v6 }
  0x17   : > { %v242_v8 = vmul.f32 %v420_v5, %v241_v7 }
  0x18   : > { %237 = vadd.xlane.f32.xlu0 %v236_v3 }
  0x19   : > { %v243_v9 = vadd.f32 %v420_v5, %v242_v8 }
  0x1b   : > { %v245_v10 = vsel %vm244_vm1, %v420_v5, %v243_v9 }
  0x83   : > { %v235_v11 = vpop.xlane.xlu0 %234 }
  0x84   : > { %v246_v12 = vmul.f32 %v245_v10, %v235_v11 }
  0x86   : > { %v248_v13 = vsub.f32 %v228_v0, %v246_v12 }
  0x88   : > { %v250_v14 = vmul.f32 %v248_v13, %v248_v13 }
  0x8a   : > { %v252_v15 = vsel %vm232_vm0, %v250_v14, 0.0 }
  0x8b   : > { %253 = vadd.xlane.f32.xlu1 %v252_v15  ;;  %v238_v16 = vpop.xlane.xlu0 %237 }
  0x8c   : > { %v247_v17 = vmul.f32 %v245_v10, %v238_v16 }
  0x8e   : > { %v249_v18 = vsub.f32 %v229_v2, %v247_v17 }
  0x90   : > { %v251_v19 = vmul.f32 %v249_v18, %v249_v18 }
  0x92   : > { %v255_v20 = vsel %vm232_vm0, %v251_v19, 0.0 }
  0x93   : > { %256 = vadd.xlane.f32.xlu1 %v255_v20 }
  0xfe   : > { %v254_v25 = vpop.xlane.xlu1 %253 }
  0xff   : > { %v258_v26 = vmul.f32 %v254_v25, %v245_v10 }
 0x101   : > { %v260_v27 = vadd.f32 1e-05, %v258_v26 }
 0x103   : > { %421 = vrsqrt.f32 %v260_v27  ;;  %vm268_vm3 = vweird.f32 %v260_v27 }
 0x106   : > { %v257_v28 = vpop.xlane.xlu1 %256 }
 0x107   : > { %v259_v29 = vmul.f32 %v257_v28, %v245_v10 }
 0x109   : > { %v422_v30 = vpop.eup %421  ;;  %v261_v31 = vadd.f32 1e-05, %v259_v29 }
 0x10a   : > { %v263_v32 = vmul.f32 %v422_v30, %v260_v27  ;;  %vm269_vm2 = vweird.f32 %v422_v30 }
 0x10b   : > { %423 = vrsqrt.f32 %v261_v31  ;;  %vm270_vm4 = vmor %vm268_vm3, %vm269_vm2  ;;  %vm278_vm6 = vweird.f32 %v261_v31 }
 0x10c   : > { %v264_v33 = vmul.f32 %v422_v30, %v263_v32 }
 0x10e   : > { %v265_v34 = vmul.f32 0.5, %v264_v33 }
 0x110   : > { %v266_v35 = vsub.f32 1.5, %v265_v34 }
 0x111   : > { %v424_v36 = vpop.eup %423 }
 0x112   : > { %v267_v37 = vmul.f32 %v422_v30, %v266_v35  ;;  %v273_v38 = vmul.f32 %v424_v36, %v261_v31  ;;  %vm279_vm5 = vweird.f32 %v424_v36 }
 0x113   : > { %vm280_vm7 = vmor %vm278_vm6, %vm279_vm5 }
 0x114   : > { %v271_v40 = vsel %vm270_vm4, %v422_v30, %v267_v37  ;;  %v274_v41 = vmul.f32 %v424_v36, %v273_v38 }
 0x115   : > { %v282_v42 = vmul.f32 %v271_v40, %v248_v13 }
 0x116   : > { %v275_v44 = vmul.f32 0.5, %v274_v41 }
 0x117   : > { %v287_v45 = vmul.f32 %v416_v39, %v282_v42 }
 0x118   : > { %v276_v46 = vsub.f32 1.5, %v275_v44 }
 0x119   : > { %v292_v47 = vadd.f32 %v417_v43, %v287_v45 }
 0x11a   : > { %v277_v48 = vmul.f32 %v424_v36, %v276_v46 }
 0x11b   : > { %399 = vmatmul.msk.f32.vlgmr.msra.gmra.mxu0 %vm232_vm0, %v292_v47 }
 0x11c   : > { %v281_v49 = vsel %vm280_vm7, %v424_v36, %v277_v48 }
 0x11d   : > { %v283_v50 = vmul.f32 %v281_v49, %v249_v18 }
 0x11f   : > { %v288_v51 = vmul.f32 %v416_v39, %v283_v50 }
 0x121   : > { %v293_v52 = vadd.f32 %v417_v43, %v288_v51 }
 0x123   : > { %400 = vmatmul.msk.f32.vlgmr.msra.gmra.mxu1 %vm232_vm0, %v293_v52 }
 0x198   : > { %v325_v54 = vpop.f32.mrf.mxu0 }
 0x199   : > { %v326_v55 = vadd.f32 %v418_v53, %v325_v54 }
 0x19b   : > { %332 = vst.msk [vmem:[%s226_s16] sm:$0xff] %vm331_vm8, %v326_v55 }
 0x1a0   : > { %v328_v56 = vpop.f32.mrf.mxu1 }
 0x1a1   : > { %v329_v57 = vadd.f32 %v418_v53, %v328_v56 }
 0x1a3   : > { %333 = vst.msk [vmem:[%s226_s16 + $0x8] sm:$0xff] %vm331_vm8, %v329_v57 }
 0x1a4 PF: > { %s15_s18 = sadd.s32 1, %s431_s18  }
 0x1a5   : > { %p12_p4 = scmp.ge.s32.totalorder %s15_s18, 4  }
 0x1a7   :  { %14 = sbr.rel (!%p12_p4) target bundleno = 1 (0x1), region = 70 }

// kernel: contour_transformer_pallas.5
= control target key start
LH: loop header
LB: loop body
LE: loop exit
PB: predicated region body
PF: predicated region fallthrough
CT: control target
= control target key end

     0   :  { %s859_s13 = smov 0   ;;  %s1021_s0 = inlined_call_operand.vmem [shape: f32[32,32], index: 0, kind: input, shape index: {}]   ;;  %s1022_s1 = inlined_call_operand.vmem [shape: f32[32,32], index: 1, kind: input, shape index: {}]   ;;  %s1023_s2 = inlined_call_operand.vmem [shape: f32[32,32], index: 2, kind: input, shape index: {}]   ;;  %s1024_s3 = inlined_call_operand.vmem [shape: f32[1,32], index: 3, kind: input, shape index: {}]   ;;  %s1025_s4 = inlined_call_operand.vmem [shape: f32[1,32], index: 4, kind: input, shape index: {}]   ;;  %s1026_s5 = inlined_call_operand.vmem [shape: f32[1,32], index: 5, kind: input, shape index: {}]   ;;  %s1027_s6 = inlined_call_operand.vmem [shape: f32[32,128], index: 6, kind: input, shape index: {}]   ;;  %s1028_s7 = inlined_call_operand.vmem [shape: f32[1,128], index: 7, kind: input, shape index: {}]   ;;  %s1029_s8 = inlined_call_operand.vmem [shape: f32[128,32], index: 8, kind: input, shape index: {}]   ;;  %s1030_s9 = inlined_call_operand.vmem [shape: f32[1,32], index: 9, kind: input, shape index: {}]   ;;  %s1031_s10 = inlined_call_operand.vmem [shape: f32[32,32], index: 10, kind: output, shape index: {}]  }
   0x1 LB: > { %s736_s14 = sadd.s32 4294967295, %s801_s13   ;;  %p740_p0 = scmp.ge.s32.totalorder %s801_s13, 1  ;;  %s801_s13 = sphi %s859_s13, %s20_s13  }
   0x2   : > { %p324_p1 = scmp.lt.s32.totalorder %s801_s13, 3 }
   0x4   : > { %p325_p2 = pnand %p740_p0, %p324_p1 }
   0x5   : > { %s741_s19 = sshll.u32 (!%p325_p2), %s736_s14, 1 }
   0x6   : > { %328 = sbr.rel (%p325_p2) target bundleno = 741 (0x2e5), region = 60  ;;  %p368_p3 = scmp.lt.s32.totalorder (!%p325_p2), %s741_s19, 3 }
   0xb   : > { %v392_v0 = vld [vmem:[%s1023_s2 + $0x18] sm:$0xff]  ;;  %v391_v1 = vld [vmem:[%s1023_s2 + $0x10] sm:$0xff]  ;;  %v390_v2 = vld [vmem:[%s1023_s2 + $0x8] sm:$0xff]  ;;  %s1033_s19 = smov (!%p368_p3, %s741_s19), 3  ;;  %vm393_vm0 = vcmask 261120   ;;  %v803_v17 = vmov 32.0  }
   0xc   : > { %412 = vmatpush.msra.mxu0 %v392_v0  ;;  %v389_v3 = vld [vmem:[%s1023_s2] sm:$0xff]  ;;  %s879_s24 = sshll.u32 %s1033_s19, 3  ;;  %785 = vrcp.f32 %v803_v17  ;;  %v497_v34 = vld [vmem:[%s1027_s6 + $0x18] sm:$0xff]  ;;  %v496_v35 = vld [vmem:[%s1027_s6 + $0x10] sm:$0xff] }
   0xd   : > { %s371_s27 = scalar_lea.vmem %s1021_s0, %s879_s24  ;;  %s377_s30 = scalar_lea.vmem %s1022_s1, %s879_s24  ;;  %v780_v7 = vld [vmem:[%s1024_s3] ss:$0 sm:$0xff]  ;;  %520 = vmatpush.msra.mxu1 %v497_v34  ;;  %v495_v36 = vld [vmem:[%s1027_s6 + $0x8] sm:$0xff]  ;;  %v626_v17 = vld [vmem:[%s1029_s8 + $0x38] sm:$0xff] }
   0xe   : > { %413 = vmatpush.msra.mxu0 %v391_v1  ;;  %v385_v4 = vld [vmem:[%s371_s27] sm:$0xff]  ;;  %v386_v5 = vld [vmem:[%s371_s27 + $0x8] sm:$0xff]  ;;  %s383_s29 = scalar_lea.vmem %s1031_s10, %s879_s24 }
   0xf   : > { %v387_v6 = vld [vmem:[%s377_s30] sm:$0xff]  ;;  %v388_v12 = vld [vmem:[%s377_s30 + $0x8] sm:$0xff]  ;;  %521 = vmatpush.msra.mxu1 %v496_v35 }
  0x10   : > { %414 = vmatpush.msra.mxu0 %v390_v2  ;;  %v494_v37 = vld [vmem:[%s1027_s6] sm:$0xff]  ;;  %v634_v2 = vld [vmem:[%s1029_s8 + $0x78] sm:$0xff]  ;;  %v620_v35 = vld [vmem:[%s1029_s8 + $0x8] sm:$0xff] }
  0x11   : > { %522 = vmatpush.msra.mxu1 %v495_v36  ;;  %v781_v52 = vld [vmem:[%s1025_s4] ss:$0 sm:$0xff]  ;;  %635 = vmatpush.msra.mxu2 %v634_v2 }
  0x12   : > { %415 = vmatpush.msra.mxu0 %v389_v3  ;;  %v786_v18 = vpop.eup %785  ;;  %v782_v56 = vld [vmem:[%s1026_s5] ss:$0 sm:$0xff]  ;;  %755 = vmatpush.msra.mxu3 %v634_v2  ;;  %v633_v3 = vld [vmem:[%s1029_s8 + $0x70] sm:$0xff] }
  0x13   : > { %747 = vmatmul.msk.f32.vlgmr.msra.gmra.mxu0 %vm393_vm0, %v385_v4  ;;  %v440_v19 = vmul.f32 32.0, %v786_v18  ;;  %vm444_vm1 = vweird.f32 %v786_v18  ;;  %523 = vmatpush.msra.mxu1 %v494_v37  ;;  %v632_v4 = vld [vmem:[%s1029_s8 + $0x68] sm:$0xff] }
  0x14   : > { %636 = vmatpush.msra.mxu2 %v633_v3  ;;  %756 = vmatpush.msra.mxu3 %v633_v3 }
  0x15   : > { %v441_v20 = vsub.f32 1.0, %v440_v19 }
  0x16   : > { %637 = vmatpush.msra.mxu2 %v632_v4  ;;  %757 = vmatpush.msra.mxu3 %v632_v4 }
  0x17   : > { %v442_v21 = vmul.f32 %v786_v18, %v441_v20 }
  0x19   : > { %v443_v22 = vadd.f32 %v786_v18, %v442_v21  ;;  %v624_v21 = vld [vmem:[%s1029_s8 + $0x28] sm:$0xff] }
  0x1b   : > { %748 = vmatmul.msk.f32.gmra.mxu0 %vm393_vm0, %v386_v5  ;;  %v445_v23 = vsel %vm444_vm1, %v786_v18, %v443_v22  ;;  %v631_v5 = vld [vmem:[%s1029_s8 + $0x60] sm:$0xff]  ;;  %v625_v18 = vld [vmem:[%s1029_s8 + $0x30] sm:$0xff] }
  0x1c   : > { %638 = vmatpush.msra.mxu2 %v631_v5  ;;  %758 = vmatpush.msra.mxu3 %v631_v5 }
  0x90   : > { %v417_v8 = vpop.f32.mrf.mxu0 }
  0x91   : > { %v423_v9 = vadd.f32 %v417_v8, %v387_v6  ;;  %v783_v6 = vld [vmem:[%s1028_s7] ss:$0 sm:$0xff] }
  0x93   : > { %v894_v10 = vadd.f32 %v780_v7, %v423_v9  ;;  %v629_v9 = vld [vmem:[%s1029_s8 + $0x50] sm:$0xff] }
  0x95   : > { %v433_v11 = vsel %vm393_vm0, %v894_v10, 0.0 }
  0x96   : > { %434 = vadd.xlane.f32.xlu0 %v433_v11 }
  0x98   : > { %v420_v13 = vpop.f32.mrf.mxu0 }
  0x99   : > { %v424_v14 = vadd.f32 %v420_v13, %v388_v12  ;;  %v628_v12 = vld [vmem:[%s1029_s8 + $0x48] sm:$0xff] }
  0x9b   : > { %v898_v15 = vadd.f32 %v780_v7, %v424_v14  ;;  %v630_v7 = vld [vmem:[%s1029_s8 + $0x58] sm:$0xff]  ;;  %v627_v14 = vld [vmem:[%s1029_s8 + $0x40] sm:$0xff] }
  0x9c   : > { %639 = vmatpush.msra.mxu2 %v630_v7  ;;  %759 = vmatpush.msra.mxu3 %v630_v7 }
  0x9d   : > { %v436_v16 = vsel %vm393_vm0, %v898_v15, 0.0 }
  0x9e   : > { %437 = vadd.xlane.f32.xlu0 %v436_v16  ;;  %640 = vmatpush.msra.mxu2 %v629_v9 }
  0x9f   : > { %760 = vmatpush.msra.mxu3 %v629_v9 }
  0xa0   : > { %641 = vmatpush.msra.mxu2 %v628_v12 }
  0xa1   : > { %761 = vmatpush.msra.mxu3 %v628_v12 }
  0xa2   : > { %642 = vmatpush.msra.mxu2 %v627_v14 }
  0xa3   : > { %762 = vmatpush.msra.mxu3 %v627_v14 }
  0xa4   : > { %643 = vmatpush.msra.mxu2 %v626_v17 }
  0xa5   : > { %763 = vmatpush.msra.mxu3 %v626_v17 }
  0xa6   : > { %644 = vmatpush.msra.mxu2 %v625_v18 }
  0xa7   : > { %764 = vmatpush.msra.mxu3 %v625_v18 }
  0xa8   : > { %645 = vmatpush.msra.mxu2 %v624_v21 }
  0xa9   : > { %765 = vmatpush.msra.mxu3 %v624_v21 }
 0x109   : > { %v435_v24 = vpop.xlane.xlu0 %434 }
 0x10a   : > { %v446_v25 = vmul.f32 %v445_v23, %v435_v24 }
 0x10c   : > { %v448_v26 = vsub.f32 %v894_v10, %v446_v25  ;;  %v623_v25 = vld [vmem:[%s1029_s8 + $0x20] sm:$0xff] }
 0x10d   : > { %646 = vmatpush.msra.mxu2 %v623_v25  ;;  %766 = vmatpush.msra.mxu3 %v623_v25 }
 0x10e   : > { %v450_v27 = vmul.f32 %v448_v26, %v448_v26 }
 0x110   : > { %v452_v28 = vsel %vm393_vm0, %v450_v27, 0.0 }
 0x111   : > { %453 = vadd.xlane.f32.xlu1 %v452_v28  ;;  %v438_v29 = vpop.xlane.xlu0 %437  ;;  %v622_v28 = vld [vmem:[%s1029_s8 + $0x18] sm:$0xff] }
 0x112   : > { %v447_v30 = vmul.f32 %v445_v23, %v438_v29  ;;  %647 = vmatpush.msra.mxu2 %v622_v28  ;;  %767 = vmatpush.msra.mxu3 %v622_v28 }
 0x114   : > { %v449_v31 = vsub.f32 %v898_v15, %v447_v30 }
 0x116   : > { %v451_v32 = vmul.f32 %v449_v31, %v449_v31 }
 0x118   : > { %v455_v33 = vsel %vm393_vm0, %v451_v32, 0.0  ;;  %v621_v32 = vld [vmem:[%s1029_s8 + $0x10] sm:$0xff] }
 0x119   : > { %456 = vadd.xlane.f32.xlu1 %v455_v33  ;;  %648 = vmatpush.msra.mxu2 %v621_v32 }
 0x11a   : > { %768 = vmatpush.msra.mxu3 %v621_v32 }
 0x11b   : > { %649 = vmatpush.msra.mxu2 %v620_v35 }
 0x11c   : > { %769 = vmatpush.msra.mxu3 %v620_v35 }
 0x184   : > { %v454_v38 = vpop.xlane.xlu1 %453 }
 0x185   : > { %v458_v39 = vmul.f32 %v454_v38, %v445_v23 }
 0x187   : > { %v460_v40 = vadd.f32 1e-05, %v458_v39 }
 0x189   : > { %787 = vrsqrt.f32 %v460_v40  ;;  %vm468_vm3 = vweird.f32 %v460_v40 }
 0x18c   : > { %v457_v41 = vpop.xlane.xlu1 %456 }
 0x18d   : > { %v459_v42 = vmul.f32 %v457_v41, %v445_v23 }
 0x18f   : > { %v788_v43 = vpop.eup %787  ;;  %v461_v44 = vadd.f32 1e-05, %v459_v42 }
 0x190   : > { %v463_v45 = vmul.f32 %v788_v43, %v460_v40  ;;  %vm469_vm2 = vweird.f32 %v788_v43  ;;  %v619_v40 = vld [vmem:[%s1029_s8] sm:$0xff] }
 0x191   : > { %789 = vrsqrt.f32 %v461_v44  ;;  %vm470_vm4 = vmor %vm468_vm3, %vm469_vm2  ;;  %vm478_vm6 = vweird.f32 %v461_v44  ;;  %650 = vmatpush.msra.mxu2 %v619_v40  ;;  %770 = vmatpush.msra.mxu3 %v619_v40 }
 0x192   : > { %v464_v46 = vmul.f32 %v788_v43, %v463_v45 }
 0x194   : > { %v465_v47 = vmul.f32 0.5, %v464_v46 }
 0x196   : > { %v466_v48 = vsub.f32 1.5, %v465_v47 }
 0x197   : > { %v790_v49 = vpop.eup %789 }
 0x198   : > { %v467_v50 = vmul.f32 %v788_v43, %v466_v48  ;;  %v473_v51 = vmul.f32 %v790_v49, %v461_v44  ;;  %vm479_vm5 = vweird.f32 %v790_v49 }
 0x199   : > { %vm480_vm7 = vmor %vm478_vm6, %vm479_vm5 }
 0x19a   : > { %v471_v53 = vsel %vm470_vm4, %v788_v43, %v467_v50  ;;  %v474_v54 = vmul.f32 %v790_v49, %v473_v51 }
 0x19b   : > { %v482_v55 = vmul.f32 %v471_v53, %v448_v26 }
 0x19c   : > { %v475_v57 = vmul.f32 0.5, %v474_v54 }
 0x19d   : > { %v487_v58 = vmul.f32 %v781_v52, %v482_v55 }
 0x19e   : > { %v476_v59 = vsub.f32 1.5, %v475_v57 }
 0x19f   : > { %v492_v60 = vadd.f32 %v782_v56, %v487_v58 }
 0x1a0   : > { %v477_v61 = vmul.f32 %v790_v49, %v476_v59 }
 0x1a1   : > { %749 = vmatmul.msk.f32.vlgmr.msra.gmra.mxu1 %vm393_vm0, %v492_v60 }
 0x1a2   : > { %v481_v62 = vsel %vm480_vm7, %v790_v49, %v477_v61 }
 0x1a3   : > { %v483_v63 = vmul.f32 %v481_v62, %v449_v31 }
 0x1a5   : > { %v488_v0 = vmul.f32 %v781_v52, %v483_v63 }
 0x1a7   : > { %v493_v1 = vadd.f32 %v782_v56, %v488_v0 }
 0x1a9   : > { %750 = vmatmul.msk.f32.gmra.mxu1 %vm393_vm0, %v493_v1 }
 0x21e   : > { %v525_v8 = vpop.f32.mrf.mxu1 }
 0x21f   : > { %v947_v11 = vadd.f32 %v783_v6, %v525_v8 }
 0x221   : > { %v953_v13 = vmul.f32 0.70710677, %v947_v11 }
 0x223   : > { %v535_v16 = vmul.f32 %v953_v13, %v953_v13 }
 0x225   : > { %v966_v19 = vmin.f32 %v535_v16, 16.0 }
 0x226   : > { %v528_v20 = vpop.f32.mrf.mxu1 }
 0x227   : > { %v537_v22 = vmul.f32 2.1237322e-06, %v966_v19  ;;  %v972_v23 = vadd.f32 %v783_v6, %v528_v20  ;;  %v548_v24 = vmul.f32 3.8918573e-05, %v966_v19 }
 0x229   : > { %v538_v26 = vadd.f32 0.00028619796, %v537_v22  ;;  %v979_v27 = vmul.f32 0.70710677, %v972_v23  ;;  %v549_v29 = vadd.f32 0.001143296, %v548_v24 }
 0x22b   : > { %v539_v30 = vmul.f32 %v538_v26, %v966_v19  ;;  %v575_v31 = vmul.f32 %v979_v27, %v979_v27  ;;  %v550_v33 = vmul.f32 %v549_v29, %v966_v19 }
 0x22d   : > { %v576_v34 = vmin.f32 %v575_v31, 16.0  ;;  %v551_v36 = vadd.f32 0.014752088, %v550_v33  ;;  %v540_v37 = vadd.f32 0.0036580483, %v539_v30  ;;  %v531_v33 = vmul.f32 0.5, %v947_v11 }
 0x22e   : > { %v784_v11 = vld [vmem:[%s1030_s9] ss:$0 sm:$0xff] }
 0x22f   : > { %v577_v38 = vmul.f32 2.1237322e-06, %v576_v34  ;;  %v588_v39 = vmul.f32 3.8918573e-05, %v576_v34  ;;  %v552_v41 = vmul.f32 %v551_v36, %v966_v19  ;;  %v541_v45 = vmul.f32 %v540_v37, %v966_v19 }
 0x231   : > { %v578_v42 = vadd.f32 0.00028619796, %v577_v38  ;;  %v589_v43 = vadd.f32 0.001143296, %v588_v39  ;;  %v553_v44 = vadd.f32 0.112945676, %v552_v41 }
 0x232   : > { %v542_v52 = vadd.f32 0.05243302, %v541_v45  ;;  %v532_v41 = vmul.f32 0.5, %v972_v23 }
 0x233   : > { %v579_v46 = vmul.f32 %v578_v42, %v576_v34  ;;  %v590_v47 = vmul.f32 %v589_v43, %v576_v34  ;;  %v554_v48 = vmul.f32 %v553_v44, %v966_v19 }
 0x234   : > { %v543_v58 = vmul.f32 %v542_v52, %v966_v19 }
 0x235   : > { %v591_v49 = vadd.f32 0.014752088, %v590_v47  ;;  %v580_v50 = vadd.f32 0.0036580483, %v579_v46  ;;  %v555_v51 = vadd.f32 0.4994258, %v554_v48 }
 0x236   : > { %v544_v62 = vadd.f32 0.18741608, %v543_v58 }
 0x237   : > { %v592_v53 = vmul.f32 %v591_v49, %v576_v34  ;;  %v556_v54 = vmul.f32 %v555_v51, %v966_v19  ;;  %v581_v56 = vmul.f32 %v580_v50, %v576_v34 }
 0x238   : > { %v545_v3 = vmul.f32 %v544_v62, %v966_v19 }
 0x239   : > { %v593_v55 = vadd.f32 0.112945676, %v592_v53  ;;  %v557_v57 = vadd.f32 1.0, %v556_v54  ;;  %v582_v61 = vadd.f32 0.05243302, %v581_v56 }
 0x23a   : > { %v546_v8 = vadd.f32 1.1283791, %v545_v3 }
 0x23b   : > { %v594_v59 = vmul.f32 %v593_v55, %v576_v34  ;;  %791 = vrcp.f32 %v557_v57  ;;  %v583_v2 = vmul.f32 %v582_v61, %v576_v34  ;;  %v569_v7 = vand.u32 2147483648, %v557_v57 }
 0x23c   : > { %v567_v12 = vand.u32 2147483647, %v557_v57  ;;  %vm563_vm9 = vweird.f32 %v557_v57  ;;  %v547_v21 = vmul.f32 %v546_v8, %v953_v13 }
 0x23d   : > { %v595_v60 = vadd.f32 0.4994258, %v594_v59  ;;  %v584_v6 = vadd.f32 0.18741608, %v583_v2  ;;  %v570_v18 = vor.u32 1.1754944e-38, %v569_v7 }
 0x23e   : > { %vm568_vm11 = vcmp.eq.f32.partialorder %v567_v12, 8.507059e+37 }
 0x23f   : > { %v596_v63 = vmul.f32 %v595_v60, %v576_v34  ;;  %v585_v17 = vmul.f32 %v584_v6, %v576_v34 }
 0x241   : > { %v597_v0 = vadd.f32 1.0, %v596_v63  ;;  %v792_v1 = vpop.eup %791  ;;  %v586_v28 = vadd.f32 1.1283791, %v585_v17 }
 0x242   : > { %v559_v4 = vmul.f32 %v792_v1, %v557_v57  ;;  %vm564_vm8 = vweird.f32 %v792_v1 }
 0x243   : > { %793 = vrcp.f32 %v597_v0  ;;  %vm565_vm10 = vmor %vm563_vm9, %vm564_vm8  ;;  %v609_v26 = vand.u32 2147483648, %v597_v0  ;;  %v607_v30 = vand.u32 2147483647, %v597_v0  ;;  %vm603_vm13 = vweird.f32 %v597_v0 }
 0x244   : > { %v560_v5 = vsub.f32 1.0, %v559_v4  ;;  %v587_v13 = vmul.f32 %v586_v28, %v979_v27 }
 0x245   : > { %v610_v35 = vor.u32 1.1754944e-38, %v609_v26  ;;  %vm608_vm15 = vcmp.eq.f32.partialorder %v607_v30, 8.507059e+37 }
 0x246   : > { %v561_v9 = vmul.f32 %v792_v1, %v560_v5 }
 0x248   : > { %v562_v16 = vadd.f32 %v792_v1, %v561_v9 }
 0x249   : > { %v794_v14 = vpop.eup %793 }
 0x24a   : > { %v599_v20 = vmul.f32 %v794_v14, %v597_v0  ;;  %v566_v22 = vsel %vm565_vm10, %v792_v1, %v562_v16  ;;  %vm604_vm12 = vweird.f32 %v794_v14 }
 0x24b   : > { %v571_v19 = vsel %vm568_vm11, %v570_v18, %v566_v22  ;;  %vm605_vm14 = vmor %vm603_vm13, %vm604_vm12 }
 0x24c   : > { %v600_v24 = vsub.f32 1.0, %v599_v20  ;;  %v572_v25 = vmul.f32 %v571_v19, %v547_v21 }
 0x24e   : > { %v601_v29 = vmul.f32 %v794_v14, %v600_v24  ;;  %v751_v31 = vclamps-f32 %v572_v25, 1.0 }
 0x250   : > { %v602_v32 = vadd.f32 %v794_v14, %v601_v29  ;;  %v615_v34 = vadd.f32 1.0, %v751_v31 }
 0x252   : > { %v606_v36 = vsel %vm605_vm14, %v794_v14, %v602_v32  ;;  %v617_v37 = vmul.f32 %v615_v34, %v531_v33 }
 0x253   : > { %v611_v38 = vsel %vm608_vm15, %v610_v35, %v606_v36 }
 0x254   : > { %v612_v39 = vmul.f32 %v611_v38, %v587_v13  ;;  %651 = vmatmul.f32.vlgmr.msra.gmra.mxu2 %v617_v37 }
 0x256   : > { %v752_v40 = vclamps-f32 %v612_v39, 1.0 }
 0x258   : > { %v616_v42 = vadd.f32 1.0, %v752_v40 }
 0x25a   : > { %v618_v43 = vmul.f32 %v616_v42, %v532_v41 }
 0x25c   : > { %654 = vmatmul.f32.vlgmr.msra.gmra.mxu3 %v618_v43 }
 0x2d7   : > { %v652_v44 = vpop.f32.mrf.mxu2 }
 0x2d8   : > { %v658_v45 = vadd.f32 %v652_v44, %v894_v10 }
 0x2da   : > { %v664_v27 = vadd.f32 %v784_v11, %v658_v45 }
 0x2dc   : > { %666 = vst.msk [vmem:[%s383_s29] sm:$0xff] %vm393_vm0, %v664_v27 }
 0x2df   : > { %v655_v46 = vpop.f32.mrf.mxu3 }
 0x2e0   : > { %v659_v23 = vadd.f32 %v655_v46, %v898_v15 }
 0x2e2   : > { %v665_v47 = vadd.f32 %v784_v11, %v659_v23 }
 0x2e4   : > { %667 = vst.msk [vmem:[%s383_s29 + $0x8] sm:$0xff] %vm393_vm0, %v665_v47 }
 0x2e5 PF: > { %s20_s13 = sadd.s32 1, %s801_s13  }
 0x2e6   : > { %p17_p4 = scmp.ge.s32.totalorder %s20_s13, 4  }
 0x2e8   :  { %19 = sbr.rel (!%p17_p4) target bundleno = 1 (0x1), region = 93 }

</bundles_post_ra>
